<compile_context>
chip_gen: v7x
topology: tpu7x:2x2x1
jax: 0.10.0
libtpu: 0.0.40
codegen_flags: <defaults>
</compile_context>

<pallas_src>
import math
import functools

import numpy as np
import jax
import jax.numpy as jnp
from jax.experimental import pallas as pl
from jax.experimental.pallas import tpu as pltpu


def _posemb_kernel(x_row_ref, x_col_ref, w_ref, out_ref):
    # x_row_ref: (1, TB)  f32   -- batch on the lane axis (compute layout)
    # x_col_ref: (TB, 1)  f32   -- batch on the sublane axis (output layout)
    # w_ref:     (H, 1)   f32   -- 2*pi already folded in
    # out_ref:   (TB, 2H + 1)
    freqs = w_ref[...] * x_row_ref[...]                              # (H, TB) outer product
    # Lane-dense sin/cos (full 128-lane vregs for VPU/EUP work).
    # TODO(synk): on v7x (VALU-bound there) share the sin/cos range reduction
    # (t - round(t), minimax polys on [-pi, pi]) instead of two library calls.
    sc = jnp.concatenate([jnp.sin(freqs), jnp.cos(freqs)], axis=0)   # (2H, TB)
    # One XLU transpose into the consumer layout, then a single merged store.
    fouriered = jnp.concatenate([x_col_ref[...], sc.T], axis=-1)     # (TB, 2H+1)
    out_ref[...] = fouriered.astype(out_ref.dtype)


@functools.partial(jax.jit, static_argnames=("tile_b", "out_dtype", "use_pallas"))
def random_or_learned_sinusoidal_pos_emb(x, weights, *, tile_b=None,
                                         out_dtype=jnp.float32,
                                         use_pallas=None):
    """x: (B,) timesteps; weights: (H,) parameter with H = dim // 2.

    Returns (B, 2*H + 1): [x, sin(2*pi*x*w), cos(2*pi*x*w)], matching the
    PyTorch module's forward.
    """
    assert x.ndim == 1 and weights.ndim == 1
    b = x.shape[0]
    h = weights.shape[0]
    n_out = 2 * h + 1

    x_f32 = x.astype(jnp.float32)
    w2pi = weights.astype(jnp.float32) * (2.0 * math.pi)   # fold 2*pi into the weights

    if use_pallas is None:
        # Tiny embeddings are launch-overhead dominated -> let XLA fuse them.
        use_kernel = b * n_out >= (1 << 18)
    else:
        use_kernel = bool(use_pallas)

    if not use_kernel:
        x2d = x_f32.reshape(b, 1)
        freqs = x2d * w2pi.reshape(1, h)
        return jnp.concatenate(
            [x2d, jnp.sin(freqs), jnp.cos(freqs)], axis=-1).astype(out_dtype)

    # ---- tile selection --------------------------------------------------
    out_itemsize = np.dtype(out_dtype).itemsize
    if tile_b is None:
        # ~2 MiB of output per grid step, 128-lane aligned, scaled with H.
        tile_b = max(128, min(65536,
                              ((2 << 20) // (n_out * out_itemsize)) // 128 * 128))
    assert tile_b % 128 == 0, "tile_b must be a multiple of 128"

    b_pad0 = pl.cdiv(b, 128) * 128          # lane-aligned batch
    tb = min(tile_b, b_pad0)
    if b_pad0 >= 2 * 128:
        # Keep >=2 grid steps so the "parallel" axis can shard across both
        # TensorCores on v7x.
        tb = min(tb, max(128, (b_pad0 // 2) // 128 * 128))
    b_pad = pl.cdiv(b, tb) * tb
    grid = (b_pad // tb,)

    x_pad = x_f32 if b_pad == b else jnp.pad(x_f32, (0, b_pad - b))
    x_row = x_pad.reshape(1, b_pad)          # lane layout (compute)
    x_col = x_pad.reshape(b_pad, 1)          # sublane layout (output x column)
    w_col = w2pi.reshape(h, 1)               # resident across the grid

    cost = pl.CostEstimate(
        flops=2 * h * b_pad,
        transcendentals=2 * h * b_pad,
        bytes_accessed=4 * (2 * b_pad + h) + out_itemsize * n_out * b_pad,
    )

    out_pad = pl.pallas_call(
        _posemb_kernel,
        out_shape=jax.ShapeDtypeStruct((b_pad, n_out), out_dtype),
        grid=grid,
        in_specs=[
            pl.BlockSpec((1, tb), lambda i: (0, i)),     # x, lane layout
            pl.BlockSpec((tb, 1), lambda i: (i, 0)),     # x, sublane layout
            pl.BlockSpec((h, 1), lambda i: (0, 0)),      # weights (resident)
        ],
        out_specs=pl.BlockSpec((tb, n_out), lambda i: (i, 0)),
        compiler_params=pltpu.CompilerParams(
            dimension_semantics=("parallel",),
        ),
        cost_estimate=cost,
    )(x_row, x_col, w_col)

    # Only padding rows to drop -- no transpose, no concat.
    return out_pad[:b] if b_pad != b else out_pad


def _reference(x, weights):
    x2d = x.reshape(-1, 1).astype(jnp.float32)
    freqs = x2d * weights.reshape(1, -1).astype(jnp.float32) * 2.0 * math.pi
    return jnp.concatenate([x2d, jnp.sin(freqs), jnp.cos(freqs)], axis=-1)


if __name__ == "__main__":
    dim = 16                       # module `dim` (must be even); half_dim = 8
    batch = 8

    key = jax.random.PRNGKey(0)
    k_w, k_x = jax.random.split(key)
    # Deterministic parameter init (replaces torch.randn(half_dim)).
    weights = jax.random.normal(k_w, (dim // 2,), dtype=jnp.float32)
    # Timesteps input x: shape (B,)
    x = jax.random.uniform(k_x, (batch,), dtype=jnp.float32)

    # Force the Pallas path so the kernel is exercised even at this small size.
    out = jax.block_until_ready(
        random_or_learned_sinusoidal_pos_emb(x, weights, use_pallas=True))
    ref = _reference(x, weights)
    assert out.shape == (batch, dim + 1), out.shape
    assert jnp.allclose(out, ref, atol=1e-5, rtol=1e-5), "mismatch vs reference"

    # Multi-step grid + padding path (batch not a multiple of the tile).
    x_big = jax.random.uniform(jax.random.PRNGKey(1), (1300,), dtype=jnp.float32)
    out_big = jax.block_until_ready(
        random_or_learned_sinusoidal_pos_emb(x_big, weights, tile_b=512,
                                             use_pallas=True))
    ref_big = _reference(x_big, weights)
    assert out_big.shape == (1300, dim + 1), out_big.shape
    assert jnp.allclose(out_big, ref_big, atol=1e-5, rtol=1e-5), "mismatch (tiled)"

    print("KERNEL_OK")
</pallas_src>

<mosaic_0001>
module attributes {stable_mosaic.version = 11 : i64} {
  func.func @_posemb_kernel(%arg0: i32, %arg1: memref<1x128xf32, #tpu.memory_space<vmem>>, %arg2: memref<128x1xf32, #tpu.memory_space<vmem>>, %arg3: memref<8x1xf32, #tpu.memory_space<vmem>>, %arg4: memref<128x17xf32, #tpu.memory_space<vmem>>) attributes {dimension_semantics = [#tpu.dimension_semantics<parallel>], iteration_bounds = array<i64: 1>, scalar_prefetch = 0 : i64, scratch_operands = 0 : i64, tpu.core_type = #tpu.core_type<tc>, window_params = [{transform_indices = @transform_0, window_bounds = array<i64: 1, 128>}, {transform_indices = @transform_1, window_bounds = array<i64: 128, 1>}, {pipeline_mode = #tpu.pipeline_mode<synchronous>, transform_indices = @transform_2, window_bounds = array<i64: 8, 1>}, {transform_indices = @transform_3, window_bounds = array<i64: 128, 17>}]} {
    %c0 = arith.constant 0 : index
    %c0_0 = arith.constant 0 : index
    %0 = vector.load %arg3[%c0, %c0_0] : memref<8x1xf32, #tpu.memory_space<vmem>>, vector<8x1xf32>
    %c0_1 = arith.constant 0 : index
    %c0_2 = arith.constant 0 : index
    %1 = vector.load %arg1[%c0_1, %c0_2] : memref<1x128xf32, #tpu.memory_space<vmem>>, vector<1x128xf32>
    %2 = vector.broadcast %0 : vector<8x1xf32> to vector<8x128xf32>
    %3 = vector.broadcast %1 : vector<1x128xf32> to vector<8x128xf32>
    %4 = arith.mulf %2, %3 : vector<8x128xf32>
    %5 = math.sin %4 : vector<8x128xf32>
    %6 = math.cos %4 : vector<8x128xf32>
    %7 = tpu.concatenate %5, %6 in 0 : vector<8x128xf32>, vector<8x128xf32> -> vector<16x128xf32>
    %c0_3 = arith.constant 0 : index
    %c0_4 = arith.constant 0 : index
    %8 = vector.load %arg2[%c0_3, %c0_4] : memref<128x1xf32, #tpu.memory_space<vmem>>, vector<128x1xf32>
    %9 = tpu.transpose %7, [1, 0] : vector<16x128xf32> -> vector<128x16xf32>
    %10 = tpu.concatenate %8, %9 in 1 : vector<128x1xf32>, vector<128x16xf32> -> vector<128x17xf32>
    %c0_5 = arith.constant 0 : index
    %c0_6 = arith.constant 0 : index
    %11 = vector.load %arg4[%c0_5, %c0_6] : memref<128x17xf32, #tpu.memory_space<vmem>>, vector<128x17xf32>
    tpu.vector_store %arg4[%c0_5, %c0_6], %10 {strides = array<i32>} : memref<128x17xf32, #tpu.memory_space<vmem>>, vector<128x17xf32>,
    return
  }
  func.func @transform_0(%arg0: i32) -> (i32, i32) {
    %c0_i32 = arith.constant 0 : i32
    %c0_i32_0 = arith.constant 0 : i32
    return %c0_i32, %arg0 : i32, i32
  }
  func.func @transform_1(%arg0: i32) -> (i32, i32) {
    %c0_i32 = arith.constant 0 : i32
    %c0_i32_0 = arith.constant 0 : i32
    return %arg0, %c0_i32 : i32, i32
  }
  func.func @transform_2(%arg0: i32) -> (i32, i32) {
    %c0_i32 = arith.constant 0 : i32
    %c0_i32_0 = arith.constant 0 : i32
    %c0_i32_1 = arith.constant 0 : i32
    return %c0_i32, %c0_i32_0 : i32, i32
  }
  func.func @transform_3(%arg0: i32) -> (i32, i32) {
    %c0_i32 = arith.constant 0 : i32
    %c0_i32_0 = arith.constant 0 : i32
    return %arg0, %c0_i32 : i32, i32
  }
}

</mosaic_0001>

<bundles_post_ra>
// kernel: random_or_learned_sinusoidal_pos_emb.1
= control target key start
LH: loop header
LB: loop body
LE: loop exit
PB: predicated region body
PF: predicated region fallthrough
CT: control target
= control target key end

     0   :  { %v412_v0 = vmov 0   ;;  %v413_v15 = vmov 683565275   ;;  %v414_v17 = vmov 2475754826   ;;  %s611_s2 = inlined_call_operand.vmem [shape: f32[8,1], index: 2, kind: input, shape index: {}]   ;;  %s612_s0 = inlined_call_operand.vmem [shape: f32[1,128], index: 0, kind: input, shape index: {}]   ;;  %s613_s1 = inlined_call_operand.vmem [shape: f32[128,1], index: 1, kind: input, shape index: {}]   ;;  %s614_s3 = inlined_call_operand.vmem [shape: f32[128,17], index: 3, kind: output, shape index: {}]  }
   0x1   :  { %407 = vset.pattern.permute.xlu0 %v412_v0  ;;  %v14_v1 = vld [vmem:[%s611_s2] sm:$0xff]  ;;  %v415_v20 = vmov 2131351028   ;;  %v416_v23 = vmov 2102212464  }
   0x2   :  { %18 = vperm.xlu0 %407, %v14_v1   ;;  %v385_v2 = vld [vmem:[%s612_s0] ss:$0 sm:$0xff]  ;;  %v417_v26 = vmov 920167782   ;;  %v418_v29 = vmov 1326507024  }
   0x3   :  { %s419_s0 = smov 1  }
  0x81   :  { %v19_v3 = vpop.permute.xlu0 %18 }
  0x82   :  { %v446_v4 = vmul.f32 %v385_v2, %v19_v3 }
  0x84   :  { %v31_v5 = vand.u32 2139095040, %v446_v4  ;;  %v28_v9 = vand.u32 2147483647, %v446_v4  ;;  %vm30_vm7 = vcmp.lt.s32.totalorder %v446_v4, 0  ;;  %vm120_vm14 = vweird.f32 %v446_v4 }
  0x86   :  { %v32_v6 = vshrl.u32 %v31_v5, 23  ;;  %v35_v12 = vand.u32 8388607, %v28_v9  ;;  %vm29_vm8 = vcmp.le.f32.partialorder %v28_v9, 0.7853982 }
  0x88   :  { %v386_v7 = vadd.s32 4294967169, %v32_v6  ;;  %v36_v31 = vor.u32 8388608, %v35_v12 }
  0x8a   :  { %v38_v8 = vadd.s32 1, %v386_v7  ;;  %v76_v45 = vshll.u32 %v36_v31, 8 }
  0x8c   :  { %vm39_vm0 = vcmp.gt.s32.totalorder %v38_v8, 0 }
  0x8d   :  { %v40_v10 = vsel %vm39_vm0, %v38_v8, 0  ;;  %vm347_vm0 = vcmask 7168  }
  0x8e   :  { %v42_v11 = vand.u32 31, %v40_v10  ;;  %v41_v14 = vshrl.u32 %v40_v10, 5 }
  0x90   :  { %v43_v13 = vsub.s32 32, %v42_v11  ;;  %v45_v16 = vshll.u32 %v413_v15, %v42_v11  ;;  %v48_v18 = vshll.u32 %v414_v17, %v42_v11  ;;  %v51_v22 = vshll.u32 %v415_v20, %v42_v11 }
  0x91   :  { %v54_v25 = vshll.u32 %v416_v23, %v42_v11  ;;  %v57_v28 = vshll.u32 %v417_v26, %v42_v11  ;;  %vm60_vm1 = vcmp.lt.s32.totalorder %v41_v14, 1  ;;  %vm63_vm2 = vcmp.lt.s32.totalorder %v41_v14, 4 }
  0x92   :  { %v46_v19 = vshrl.u32 %v414_v17, %v43_v13  ;;  %v49_v21 = vshrl.u32 %v415_v20, %v43_v13  ;;  %v52_v24 = vshrl.u32 %v416_v23, %v43_v13  ;;  %v55_v27 = vshrl.u32 %v417_v26, %v43_v13 }
  0x93   :  { %v58_v30 = vshrl.u32 %v418_v29, %v43_v13  ;;  %v44_v40 = vshrl.u32 %v413_v15, %v43_v13  ;;  %vm62_vm3 = vcmp.lt.s32.totalorder %v41_v14, 3  ;;  %vm61_vm4 = vcmp.lt.s32.totalorder %v41_v14, 2 }
  0x94   :  { %v47_v32 = vor.u32 %v46_v19, %v45_v16  ;;  %v50_v33 = vor.u32 %v49_v21, %v48_v18  ;;  %v53_v34 = vor.u32 %v52_v24, %v51_v22  ;;  %v56_v35 = vor.u32 %v55_v27, %v54_v25 }
  0x95   :  { %v59_v36 = vor.u32 %v58_v30, %v57_v28 }
  0x96   :  { %v65_v37 = vsel %vm63_vm2, %v53_v34, 2102212464  ;;  %v68_v38 = vsel %vm60_vm1, %v47_v32, %v50_v33  ;;  %v72_v39 = vsel %vm60_vm1, %v50_v33, %v53_v34  ;;  %v69_v41 = vsel %vm63_vm2, %v56_v35, 920167782 }
  0x97   :  { %v73_v42 = vsel %vm63_vm2, %v59_v36, 1326507024  ;;  %v70_v43 = vsel %vm62_vm3, %v53_v34, %v69_v41  ;;  %v64_v46 = vsel %vm60_vm1, %v44_v40, %v47_v32  ;;  %v66_v47 = vsel %vm62_vm3, %v50_v33, %v65_v37 }
  0x98   :  { %v74_v44 = vsel %vm62_vm3, %v56_v35, %v73_v42  ;;  %v71_v48 = vsel %vm61_vm4, %v68_v38, %v70_v43  ;;  %v67_v54 = vsel %vm61_vm4, %v64_v46, %v66_v47  ;;  %vm364_vm1 = vcmask 138240  }
  0x99   :  { %v75_v49 = vsel %vm61_vm4, %v72_v39, %v74_v44  ;;  %v455_v52 = vmul.u32.u64.low %v76_v45, %v71_v48  ;;  %v456_v53 = vmul.u32.u64.high %v76_v45, %v71_v48, %v455_v52  ;;  %v83_v56 = vmul.u32 %v76_v45, %v67_v54 }
  0x9a   :  { %v452_v50 = vmul.u32.u64.low %v76_v45, %v75_v49  ;;  %v453_v51 = vmul.u32.u64.high %v76_v45, %v75_v49, %v452_v50 }
  0x9b   :  { %v86_v55 = vadd.s32 1, %v456_v53 }
  0x9c   :  { %vm85_vm5 = vc.u32 %v453_v51, %v455_v52  ;;  %v84_v5 = vadd.s32 %v455_v52, %v453_v51 }
  0x9d   :  { %v87_v57 = vsel %vm85_vm5, %v86_v55, %v456_v53  ;;  %v235_v53 = vld [vmem:[%s613_s1] sm:$0xff] }
  0x9e   :  { %v88_v58 = vadd.s32 %v87_v57, %v83_v56  ;;  %v236_v56 = vld [vmem:[%s613_s1 + $0x8] sm:$0xff] }
  0xa0   :  { %v89_v59 = vadd.s32 536870912, %v88_v58 }
  0xa2   :  { %v90_v60 = vshrl.u32 %v89_v59, 30  ;;  %v237_v59 = vld [vmem:[%s613_s1 + $0x10] sm:$0xff] }
  0xa4   :  { %v91_v61 = vshll.u32 %v90_v60, 30  ;;  %v114_v18 = vsub.s32 4, %v90_v60 }
  0xa6   :  { %v92_v62 = vsub.s32 %v88_v58, %v91_v61  ;;  %v115_v21 = vsel %vm30_vm7, %v114_v18, %v90_v60  ;;  %v244_v18 = vld [vmem:[%s613_s1 + $0x48] sm:$0xff] }
  0xa7   :  { %v117_v23 = vsel %vm29_vm8, 0, %v115_v21  ;;  %v245_v21 = vld [vmem:[%s613_s1 + $0x50] sm:$0xff] }
  0xa8   :  { %v94_v63 = vsub.s32 0, %v92_v62  ;;  %v121_v24 = vadd.s32 3, %v117_v23  ;;  %v225_v26 = vand.u32 3, %v117_v23 }
  0xaa   :  { %v387_v0 = vmin.u32 %v94_v63, %v92_v62  ;;  %v122_v25 = vand.u32 3, %v121_v24  ;;  %vm227_vm11 = vcmp.eq.s32.totalorder %v225_v26, 0  ;;  %vm230_vm12 = vcmp.eq.s32.totalorder %v225_v26, 2  ;;  %v246_v24 = vld [vmem:[%s613_s1 + $0x58] sm:$0xff] }
  0xab   :  { %vm226_vm15 = vcmp.lt.s32.totalorder %v225_v26, 2 }
  0xac   :  { %v96_v1 = vclz %v387_v0  ;;  %vm127_vm9 = vcmp.eq.s32.totalorder %v122_v25, 2  ;;  %vm124_vm10 = vcmp.eq.s32.totalorder %v122_v25, 0  ;;  %vm123_vm13 = vcmp.lt.s32.totalorder %v122_v25, 2 }
  0xae   :  { %v388_v2 = vadd.s32 4294967294, %v96_v1  ;;  %v239_v1 = vld [vmem:[%s613_s1 + $0x20] sm:$0xff] }
  0xb0   :  { %vm389_vm6 = vcmp.lt.s32.totalorder %v388_v2, 0 }
  0xb1   :  { %v99_v3 = vsel %vm389_vm6, 0, %v388_v2 }
  0xb2   :  { %v100_v6 = vsub.s32 32, %v99_v3  ;;  %v104_v7 = vsub.s32 4294967266, %v99_v3  ;;  %v101_v8 = vshll.u32 %v92_v62, %v99_v3  ;;  %v238_v62 = vld [vmem:[%s613_s1 + $0x18] sm:$0xff] }
  0xb4   :  { %v102_v10 = vshrl.u32 %v84_v5, %v100_v6  ;;  %v105_v11 = vadd.s32 127, %v104_v7  ;;  %v240_v5 = vld [vmem:[%s613_s1 + $0x28] sm:$0xff] }
  0xb6   :  { %v103_v12 = vor.u32 %v102_v10, %v101_v8  ;;  %v106_v13 = vshll.u32 %v105_v11, 23  ;;  %v241_v8 = vld [vmem:[%s613_s1 + $0x30] sm:$0xff] }
  0xb8   :  { %v107_v14 = vor.u32 4788187, %v106_v13  ;;  %v110_v16 = vcvt.s32.f32 %v103_v12  ;;  %v242_v12 = vld [vmem:[%s613_s1 + $0x38] sm:$0xff] }
  0xba   :  { %v108_v15 = vand.u32 2147483647, %v107_v14 }
  0xbc   :  { %v111_v17 = vmul.f32 %v110_v16, %v108_v15  ;;  %v243_v15 = vld [vmem:[%s613_s1 + $0x40] sm:$0xff] }
  0xbe   :  { %v112_v19 = vxor.u32 2147483648, %v111_v17 }
  0xc0   :  { %v113_v20 = vsel %vm30_vm7, %v112_v19, %v111_v17 }
  0xc1   :  { %v116_v22 = vsel %vm29_vm8, %v446_v4, %v113_v20 }
  0xc2   :  { %408 = vcosq.f32 %v116_v22 }
  0xc3   :  { %410 = vsinq.f32 %v116_v22 }
  0xcc   :  { %v409_v27 = vpop.eup %408 }
  0xcd   :  { %v411_v28 = vpop.eup %410  ;;  %v128_v29 = vxor.u32 2147483648, %v409_v27 }
  0xce   :  { %v125_v30 = vxor.u32 2147483648, %v411_v28 }
  0xcf   :  { %v129_v31 = vsel %vm127_vm9, %v128_v29, %v411_v28  ;;  %v232_v33 = vsel %vm230_vm12, %v128_v29, %v411_v28 }
  0xd0   :  { %v126_v9 = vsel %vm124_vm10, %v409_v27, %v125_v30  ;;  %v229_v32 = vsel %vm227_vm11, %v409_v27, %v125_v30  ;;  %v247_v27 = vld [vmem:[%s613_s1 + $0x60] sm:$0xff]  ;;  %v248_v30 = vld [vmem:[%s613_s1 + $0x68] sm:$0xff] }
  0xd1   :  { %v130_v34 = vsel %vm123_vm13, %v126_v9, %v129_v31  ;;  %v233_v36 = vsel %vm226_vm15, %v229_v32, %v232_v33  ;;  %v249_v32 = vld [vmem:[%s613_s1 + $0x70] sm:$0xff] }
  0xd2   :  { %v131_v35 = vsel %vm120_vm14, nan, %v130_v34  ;;  %v234_v37 = vsel %vm120_vm14, nan, %v233_v36 }
  0xd3   :  { %251 = vxpose.xlu0.b32.start [1/2] (short) %v131_v35, 128  ;;  %v250_v35 = vld [vmem:[%s613_s1 + $0x78] sm:$0xff] }
  0xd7   :  { %252 = vxpose.xlu0.b32.end [2/2] (short) %v234_v37, 128 }
 0x153   :  { %v267_v38 = vpop.trf.xlu0 }
 0x154   :  { %299 = vrot.lane.b32.xlu1 %v267_v38, %s419_s0 }
 0x157   :  { %v268_v39 = vpop.trf.xlu0 }
 0x158   :  { %301 = vrot.lane.b32.xlu1 %v268_v39, %s419_s0 }
 0x15b   :  { %v269_v40 = vpop.trf.xlu0 }
 0x15c   :  { %303 = vrot.lane.b32.xlu1 %v269_v40, %s419_s0 }
 0x15f   :  { %v270_v41 = vpop.trf.xlu0 }
 0x160   :  { %305 = vrot.lane.b32.xlu1 %v270_v41, %s419_s0 }
 0x163   :  { %v271_v4 = vpop.trf.xlu0 }
 0x164   :  { %307 = vrot.lane.b32.xlu1 %v271_v4, %s419_s0 }
 0x167   :  { %v272_v42 = vpop.trf.xlu0 }
 0x168   :  { %309 = vrot.lane.b32.xlu1 %v272_v42, %s419_s0 }
 0x16b   :  { %v273_v43 = vpop.trf.xlu0 }
 0x16c   :  { %311 = vrot.lane.b32.xlu1 %v273_v43, %s419_s0 }
 0x16f   :  { %v274_v44 = vpop.trf.xlu0 }
 0x170   :  { %313 = vrot.lane.b32.xlu1 %v274_v44, %s419_s0 }
 0x173   :  { %v275_v45 = vpop.trf.xlu0 }
 0x174   :  { %315 = vrot.lane.b32.xlu1 %v275_v45, %s419_s0 }
 0x177   :  { %v276_v46 = vpop.trf.xlu0 }
 0x178   :  { %317 = vrot.lane.b32.xlu1 %v276_v46, %s419_s0 }
 0x17b   :  { %v277_v47 = vpop.trf.xlu0 }
 0x17c   :  { %319 = vrot.lane.b32.xlu0 %v277_v47, %s419_s0 }
 0x17f   :  { %v278_v48 = vpop.trf.xlu0 }
 0x180   :  { %321 = vrot.lane.b32.xlu1 %v278_v48, %s419_s0 }
 0x183   :  { %v279_v49 = vpop.trf.xlu0 }
 0x184   :  { %323 = vrot.lane.b32.xlu1 %v279_v49, %s419_s0 }
 0x187   :  { %v280_v50 = vpop.trf.xlu0 }
 0x188   :  { %325 = vrot.lane.b32.xlu1 %v280_v50, %s419_s0 }
 0x18b   :  { %v281_v51 = vpop.trf.xlu0 }
 0x18c   :  { %327 = vrot.lane.b32.xlu1 %v281_v51, %s419_s0 }
 0x18f   :  { %v282_v52 = vpop.trf.xlu0 }
 0x190   :  { %329 = vrot.lane.b32.xlu1 %v282_v52, %s419_s0 }
 0x1c6   :  { %v300_v54 = vpop.permute.xlu1 %299 }
 0x1c7   :  { %v348_v55 = vsel %vm347_vm0, %v235_v53, %v300_v54 }
 0x1c8   :  { %365 = vst.msk [vmem:[%s614_s3] sm:$0xff] %vm364_vm1, %v348_v55 }
 0x1ca   :  { %v302_v57 = vpop.permute.xlu1 %301 }
 0x1cb   :  { %v349_v58 = vsel %vm347_vm0, %v236_v56, %v302_v57 }
 0x1cc   :  { %366 = vst.msk [vmem:[%s614_s3 + $0x8] sm:$0xff] %vm364_vm1, %v349_v58 }
 0x1ce   :  { %v304_v60 = vpop.permute.xlu1 %303 }
 0x1cf   :  { %v350_v61 = vsel %vm347_vm0, %v237_v59, %v304_v60 }
 0x1d0   :  { %367 = vst.msk [vmem:[%s614_s3 + $0x10] sm:$0xff] %vm364_vm1, %v350_v61 }
 0x1d2   :  { %v306_v63 = vpop.permute.xlu1 %305 }
 0x1d3   :  { %v351_v0 = vsel %vm347_vm0, %v238_v62, %v306_v63 }
 0x1d4   :  { %368 = vst.msk [vmem:[%s614_s3 + $0x18] sm:$0xff] %vm364_vm1, %v351_v0 }
 0x1d6   :  { %v308_v2 = vpop.permute.xlu1 %307 }
 0x1d7   :  { %v352_v3 = vsel %vm347_vm0, %v239_v1, %v308_v2 }
 0x1d8   :  { %369 = vst.msk [vmem:[%s614_s3 + $0x20] sm:$0xff] %vm364_vm1, %v352_v3 }
 0x1da   :  { %v310_v6 = vpop.permute.xlu1 %309 }
 0x1db   :  { %v353_v7 = vsel %vm347_vm0, %v240_v5, %v310_v6 }
 0x1dc   :  { %370 = vst.msk [vmem:[%s614_s3 + $0x28] sm:$0xff] %vm364_vm1, %v353_v7 }
 0x1de   :  { %v312_v10 = vpop.permute.xlu1 %311 }
 0x1df   :  { %v354_v11 = vsel %vm347_vm0, %v241_v8, %v312_v10 }
 0x1e0   :  { %371 = vst.msk [vmem:[%s614_s3 + $0x30] sm:$0xff] %vm364_vm1, %v354_v11 }
 0x1e2   :  { %v314_v13 = vpop.permute.xlu1 %313 }
 0x1e3   :  { %v355_v14 = vsel %vm347_vm0, %v242_v12, %v314_v13 }
 0x1e4   :  { %372 = vst.msk [vmem:[%s614_s3 + $0x38] sm:$0xff] %vm364_vm1, %v355_v14 }
 0x1e6   :  { %v316_v16 = vpop.permute.xlu1 %315 }
 0x1e7   :  { %v356_v17 = vsel %vm347_vm0, %v243_v15, %v316_v16 }
 0x1e8   :  { %373 = vst.msk [vmem:[%s614_s3 + $0x40] sm:$0xff] %vm364_vm1, %v356_v17 }
 0x1ea   :  { %v318_v19 = vpop.permute.xlu1 %317 }
 0x1eb   :  { %v357_v20 = vsel %vm347_vm0, %v244_v18, %v318_v19 }
 0x1ec   :  { %374 = vst.msk [vmem:[%s614_s3 + $0x48] sm:$0xff] %vm364_vm1, %v357_v20 }
 0x1ee   :  { %v320_v22 = vpop.permute.xlu0 %319 }
 0x1ef   :  { %v358_v23 = vsel %vm347_vm0, %v245_v21, %v320_v22 }
 0x1f0   :  { %375 = vst.msk [vmem:[%s614_s3 + $0x50] sm:$0xff] %vm364_vm1, %v358_v23 }
 0x1f2   :  { %v322_v25 = vpop.permute.xlu1 %321 }
 0x1f3   :  { %v359_v26 = vsel %vm347_vm0, %v246_v24, %v322_v25 }
 0x1f4   :  { %376 = vst.msk [vmem:[%s614_s3 + $0x58] sm:$0xff] %vm364_vm1, %v359_v26 }
 0x1f6   :  { %v324_v28 = vpop.permute.xlu1 %323 }
 0x1f7   :  { %v360_v29 = vsel %vm347_vm0, %v247_v27, %v324_v28 }
 0x1f8   :  { %377 = vst.msk [vmem:[%s614_s3 + $0x60] sm:$0xff] %vm364_vm1, %v360_v29 }
 0x1fa   :  { %v326_v31 = vpop.permute.xlu1 %325 }
 0x1fb   :  { %v361_v9 = vsel %vm347_vm0, %v248_v30, %v326_v31 }
 0x1fc   :  { %378 = vst.msk [vmem:[%s614_s3 + $0x68] sm:$0xff] %vm364_vm1, %v361_v9 }
 0x1fe   :  { %v328_v33 = vpop.permute.xlu1 %327 }
 0x1ff   :  { %v362_v34 = vsel %vm347_vm0, %v249_v32, %v328_v33 }
 0x200   :  { %379 = vst.msk [vmem:[%s614_s3 + $0x70] sm:$0xff] %vm364_vm1, %v362_v34 }
 0x202   :  { %v330_v36 = vpop.permute.xlu1 %329 }
 0x203   :  { %v363_v37 = vsel %vm347_vm0, %v250_v35, %v330_v36 }
 0x204   :  { %380 = vst.msk [vmem:[%s614_s3 + $0x78] sm:$0xff] %vm364_vm1, %v363_v37 }

</bundles_post_ra>
